<compile_context>
chip_gen: v7x
topology: tpu7x:2x2x1
jax: 0.10.0
libtpu: 0.0.40
codegen_flags: <defaults>
</compile_context>

<pallas_src>
import functools

import jax
import jax.numpy as jnp
from jax import lax
from jax.experimental import pallas as pl
from jax.experimental.pallas import tpu as pltpu


def _shift_kernel(vol_ref, byxT_ref, wzc_ref, out_ref):
    # vol_ref  : (NB, h*C, h*h)  rows = (z_in, c), lanes = (y_in, x_in)
    # byxT_ref : (NB, h*h, h*h)  kron(Wy, Wx)^T per sample
    # wzc_ref  : (NB, h*C, h*C)  kron(Wz, I_C)  per sample
    # out_ref  : (NB, h*C, h*h)  rows = (z_out, c), lanes = (y_out, x_out)
    nb = vol_ref.shape[0]                      # compile-time -> static unroll
    for b in range(nb):
        # (h*C, h*h) @ (h*h, h*h): contract the (y, x) axes for ALL channels
        # in one MXU matmul (channels fused into the M/sublane dimension).
        t1 = jnp.dot(vol_ref[b], byxT_ref[b],
                     preferred_element_type=jnp.float32)
        # (h*C, h*C) @ (h*C, h*h): contract the z axis; kron(Wz, I_C) keeps
        # the (z, c) row ordering so no in-kernel reshape is ever needed.
        out = jnp.dot(wzc_ref[b], t1, preferred_element_type=jnp.float32)
        out_ref[b] = out.astype(out_ref.dtype)


def _axis_weight_matrices(shift_int, h, pad):
    """Per-axis linear-interp sampling matrices, float32, shape (n, 3, h, h).

    Replicate padding and grid_sample's padding_mode='zeros' are folded in, so
    these matrices act directly on the UNPADDED axis of length h.
    """
    D = h + 2 * pad
    eps = 1.0 / D
    lin = jnp.linspace(-1.0 + eps, 1.0 - eps, D, dtype=jnp.float32)[:h]   # (h,)
    shift = shift_int.astype(jnp.float32) * (2.0 / D)                     # (n,3)
    coords = lin[None, None, :] + shift[:, :, None]                       # (n,3,h)
    # Un-normalize (align_corners=False): position in the padded frame.
    pos = ((coords + 1.0) * D - 1.0) * 0.5
    i0f = jnp.floor(pos)
    w1 = pos - i0f
    w0 = 1.0 - w1
    i0 = i0f.astype(jnp.int32)
    i1 = i0 + 1
    # padding_mode='zeros': samples outside the padded frame contribute 0.
    # (At the top edge a ~ulp-sized weight on column D is deliberately dropped
    #  -- this matches grid_sample's zeros semantics; do NOT clamp it.)
    v0 = ((i0 >= 0) & (i0 <= D - 1)).astype(jnp.float32)
    v1 = ((i1 >= 0) & (i1 <= D - 1)).astype(jnp.float32)
    # Replicate pad folded in: padded index -> clamped unpadded index.
    u0 = jnp.clip(i0 - pad, 0, h - 1)
    u1 = jnp.clip(i1 - pad, 0, h - 1)
    cols = jnp.arange(h, dtype=jnp.int32)[None, None, None, :]
    m0 = (cols == u0[..., None]).astype(jnp.float32)
    m1 = (cols == u1[..., None]).astype(jnp.float32)
    # Both corners may clamp to the same edge column; the add accumulates them,
    # which is exactly replicate-pad behaviour.
    W = (w0 * v0)[..., None] * m0 + (w1 * v1)[..., None] * m1             # (n,3,h,h)
    return W


def _samples_per_step(n):
    """Amortize per-grid-step overhead over several samples, but keep >= 2
    grid steps when possible (v7x megacore can use both TensorCores)."""
    best = 1
    for nb in range(1, min(n, 8) + 1):
        if n % nb == 0 and (n // nb >= 2 or n == 1):
            best = nb
    return best


@functools.partial(jax.jit, static_argnums=(1,))
def random_shifts_aug_3d(x, pad, key):
    """Forward pass of RandomShiftsAug3D. x: (n, c, d, h, w) with d == h == w."""
    n, c, d, h, w = x.shape
    assert h == w and h == d
    dtype = x.dtype
    h2 = h * h
    hc = h * c

    # Per-sample integer shifts for the (x, y, z) grid channels.
    shift_int = jax.random.randint(key, (n, 3), 0, 2 * pad + 1)           # (n,3)

    # Weight construction in float32 regardless of x.dtype.
    W = _axis_weight_matrices(shift_int, h, pad)                          # (n,3,h,h)
    Wx, Wy, Wz = W[:, 0], W[:, 1], W[:, 2]

    # kron(Wy, Wx)^T per sample: rows (y_in, x_in), cols (y_out, x_out).
    byxT = (jnp.swapaxes(Wy, 1, 2)[:, :, None, :, None] *
            jnp.swapaxes(Wx, 1, 2)[:, None, :, None, :]).reshape(n, h2, h2)
    # kron(Wz, I_C) per sample: rows (z_out, c), cols (z_in, c).
    wzc = (Wz[:, :, None, :, None] *
           jnp.eye(c, dtype=jnp.float32)[None, None, :, None, :]
           ).reshape(n, hc, hc)

    # Volume presented as (n, z, c, y, x) flattened to (n, h*C, h*h):
    # rows = (z_in, c), lanes = (y_in, x_in).  No padded copy, no in-kernel
    # reshapes.  Weights cast to x.dtype so matmul operand dtypes match.
    vol = jnp.transpose(x, (0, 2, 1, 3, 4)).reshape(n, hc, h2)
    byxT = byxT.astype(dtype)
    wzc = wzc.astype(dtype)

    nb = _samples_per_step(n)
    grid = (n // nb,)

    out = pl.pallas_call(
        _shift_kernel,
        out_shape=jax.ShapeDtypeStruct((n, hc, h2), dtype),
        grid_spec=pltpu.PrefetchScalarGridSpec(
            num_scalar_prefetch=0,
            grid=grid,
            in_specs=[
                pl.BlockSpec((nb, hc, h2), lambda i: (i, 0, 0)),
                pl.BlockSpec((nb, h2, h2), lambda i: (i, 0, 0)),
                pl.BlockSpec((nb, hc, hc), lambda i: (i, 0, 0)),
            ],
            out_specs=pl.BlockSpec((nb, hc, h2), lambda i: (i, 0, 0)),
        ),
        compiler_params=pltpu.CompilerParams(
            dimension_semantics=("parallel",)),
    )(vol, byxT, wzc)

    # (n, z_out*C, y_out*x_out) -> (n, C, z, y, x): free layout plumbing.
    out = out.reshape(n, h, c, h, h).transpose(0, 2, 1, 3, 4)
    return out, shift_int


if __name__ == "__main__":
    key = jax.random.PRNGKey(0)
    kx, ks = jax.random.split(key)

    n, c, s = 2, 4, 16         # batch, channels, spatial (d = h = w = s)
    pad = 4
    x = jax.random.normal(kx, (n, c, s, s, s), dtype=jnp.float32)

    out, shift_int = random_shifts_aug_3d(x, pad, ks)
    out = jax.block_until_ready(out)
    assert out.shape == (n, c, s, s, s)

    # Reference: shifts are exact integer multiples of a grid cell, so the
    # trilinear grid_sample reduces to an integer crop of the replicate-padded
    # volume at offsets (shift_z, shift_y, shift_x).
    xp = jnp.pad(x, ((0, 0), (0, 0), (pad, pad), (pad, pad), (pad, pad)),
                 mode='edge')
    ref = jnp.stack([
        lax.dynamic_slice(
            xp[i],
            (0, int(shift_int[i, 2]), int(shift_int[i, 1]), int(shift_int[i, 0])),
            (c, s, s, s))
        for i in range(n)])
    assert jnp.allclose(out, ref, rtol=1e-4, atol=1e-4), "mismatch vs reference"

    print("KERNEL_OK")
</pallas_src>

<mosaic_0001>
module attributes {stable_mosaic.version = 11 : i64} {
  func.func @_shift_kernel(%arg0: i32, %arg1: memref<1x64x256xf32, #tpu.memory_space<vmem>>, %arg2: memref<1x256x256xf32, #tpu.memory_space<vmem>>, %arg3: memref<1x64x64xf32, #tpu.memory_space<vmem>>, %arg4: memref<1x64x256xf32, #tpu.memory_space<vmem>>) attributes {dimension_semantics = [#tpu.dimension_semantics<parallel>], iteration_bounds = array<i64: 2>, scalar_prefetch = 0 : i64, scratch_operands = 0 : i64, tpu.core_type = #tpu.core_type<tc>, window_params = [{transform_indices = @transform_0, window_bounds = array<i64: 1, 64, 256>}, {transform_indices = @transform_1, window_bounds = array<i64: 1, 256, 256>}, {transform_indices = @transform_2, window_bounds = array<i64: 1, 64, 64>}, {transform_indices = @transform_3, window_bounds = array<i64: 1, 64, 256>}]} {
    %c0 = arith.constant 0 : index
    %c0_0 = arith.constant 0 : index
    %c0_1 = arith.constant 0 : index
    %0 = vector.load %arg1[%c0, %c0_0, %c0_1] : memref<1x64x256xf32, #tpu.memory_space<vmem>>, vector<1x64x256xf32>
    %1 = vector.shape_cast %0 : vector<1x64x256xf32> to vector<64x256xf32>
    %c0_2 = arith.constant 0 : index
    %c0_3 = arith.constant 0 : index
    %c0_4 = arith.constant 0 : index
    %2 = vector.load %arg2[%c0_2, %c0_3, %c0_4] : memref<1x256x256xf32, #tpu.memory_space<vmem>>, vector<1x256x256xf32>
    %3 = vector.shape_cast %2 : vector<1x256x256xf32> to vector<256x256xf32>
    %cst = arith.constant dense<0.000000e+00> : vector<64x256xf32>
    %4 = tpu.matmul %1, %3, %cst {dimension_numbers = #tpu.dot_dimension_numbers<[1], [0], [0], [1], [0, 0, 1, 1], [], []>} : vector<64x256xf32>, vector<256x256xf32>, vector<64x256xf32> -> vector<64x256xf32>
    %c0_5 = arith.constant 0 : index
    %c0_6 = arith.constant 0 : index
    %c0_7 = arith.constant 0 : index
    %5 = vector.load %arg3[%c0_5, %c0_6, %c0_7] : memref<1x64x64xf32, #tpu.memory_space<vmem>>, vector<1x64x64xf32>
    %6 = vector.shape_cast %5 : vector<1x64x64xf32> to vector<64x64xf32>
    %cst_8 = arith.constant dense<0.000000e+00> : vector<64x256xf32>
    %7 = tpu.matmul %6, %4, %cst_8 {dimension_numbers = #tpu.dot_dimension_numbers<[1], [0], [0], [1], [0, 0, 1, 1], [], []>} : vector<64x64xf32>, vector<64x256xf32>, vector<64x256xf32> -> vector<64x256xf32>
    %c0_9 = arith.constant 0 : index
    %c0_10 = arith.constant 0 : index
    %c0_11 = arith.constant 0 : index
    %8 = vector.load %arg4[%c0_9, %c0_10, %c0_11] : memref<1x64x256xf32, #tpu.memory_space<vmem>>, vector<1x64x256xf32>
    %9 = vector.shape_cast %8 : vector<1x64x256xf32> to vector<64x256xf32>
    %10 = vector.shape_cast %7 : vector<64x256xf32> to vector<1x64x256xf32>
    tpu.vector_store %arg4[%c0_9, %c0_10, %c0_11], %10 {strides = array<i32>} : memref<1x64x256xf32, #tpu.memory_space<vmem>>, vector<1x64x256xf32>,
    return
  }
  func.func @transform_0(%arg0: i32) -> (i32, i32, i32) {
    %c0_i32 = arith.constant 0 : i32
    %c0_i32_0 = arith.constant 0 : i32
    %c0_i32_1 = arith.constant 0 : i32
    return %arg0, %c0_i32, %c0_i32_0 : i32, i32, i32
  }
  func.func @transform_1(%arg0: i32) -> (i32, i32, i32) {
    %c0_i32 = arith.constant 0 : i32
    %c0_i32_0 = arith.constant 0 : i32
    %c0_i32_1 = arith.constant 0 : i32
    return %arg0, %c0_i32, %c0_i32_0 : i32, i32, i32
  }
  func.func @transform_2(%arg0: i32) -> (i32, i32, i32) {
    %c0_i32 = arith.constant 0 : i32
    %c0_i32_0 = arith.constant 0 : i32
    %c0_i32_1 = arith.constant 0 : i32
    return %arg0, %c0_i32, %c0_i32_0 : i32, i32, i32
  }
  func.func @transform_3(%arg0: i32) -> (i32, i32, i32) {
    %c0_i32 = arith.constant 0 : i32
    %c0_i32_0 = arith.constant 0 : i32
    %c0_i32_1 = arith.constant 0 : i32
    return %arg0, %c0_i32, %c0_i32_0 : i32, i32, i32
  }
}

</mosaic_0001>

<bundles_post_ra>
// kernel: random_shifts_aug_3d.1
= control target key start
LH: loop header
LB: loop body
LE: loop exit
PB: predicated region body
PF: predicated region fallthrough
CT: control target
= control target key end

     0   :  { %s790_s12 = smov 0   ;;  %s932_s0 = inlined_call_operand.vmem [shape: f32[2,64,256], index: 0, kind: input, shape index: {}]   ;;  %s933_s1 = inlined_call_operand.vmem [shape: f32[2,256,256], index: 1, kind: input, shape index: {}]   ;;  %s934_s2 = inlined_call_operand.vmem [shape: f32[2,64,64], index: 2, kind: input, shape index: {}]   ;;  %s935_s3 = inlined_call_operand.vmem [shape: f32[2,64,256], index: 3, kind: output, shape index: {}]  }
   0x1 LB: > { %s645_s13 = sadd.s32 4294967295, %s767_s12   ;;  %p649_p0 = scmp.ge.s32.totalorder %s767_s12, 1  ;;  %s767_s12 = sphi %s790_s12, %s13_s12  }
   0x2   : > { %p157_p1 = scmp.lt.s32.totalorder %s767_s12, 3 }
   0x4   : > { %p158_p2 = pnand %p649_p0, %p157_p1 }
   0x5   : > { %p191_p3 = scmp.lt.s32.totalorder (!%p158_p2), %s645_s13, 1  ;;  %vm412_vm0 = vcmask (!%p158_p2), 523264  }
   0x6   : > { %161 = sbr.rel (%p158_p2) target bundleno = 572 (0x23c), region = 32 }
   0xd   : > { %s937_s13 = smov (!%p191_p3, %s645_s13), 1 }
   0xe   : > { %s669_s14 = sshll.u32 %s937_s13, 9  ;;  %s668_s18 = sshll.u32 %s937_s13, 7 }
   0xf   : > { %s804_s17 = scalar_lea.vmem %s933_s1, %s669_s14  ;;  %s838_s21 = scalar_lea.vmem %s932_s0, %s668_s18 }
  0x10   : > { %v228_v0 = vld [vmem:[%s804_s17 + $0x8] sm:$0xff]  ;;  %v230_v1 = vld [vmem:[%s804_s17 + $0x18] sm:$0xff]  ;;  %v227_v2 = vld [vmem:[%s804_s17] sm:$0xff]  ;;  %s670_s22 = sshll.u32 %s937_s13, 6  ;;  %s911_s28 = scalar_lea.vmem %s935_s3, %s668_s18 }
  0x11   : > { %v672_v3 = vpack.c.bf16 %v230_v1, %v228_v0  ;;  %v229_v4 = vld [vmem:[%s804_s17 + $0x10] sm:$0xff]  ;;  %v232_v5 = vld [vmem:[%s804_s17 + $0x28] sm:$0xff]  ;;  %v234_v6 = vld [vmem:[%s804_s17 + $0x38] sm:$0xff]  ;;  %s205_s25 = scalar_lea.vmem %s934_s2, %s670_s22 }
  0x12   : > { %v674_v7 = vpack.c.bf16 %v229_v4, %v227_v2  ;;  %v676_v8 = vpack.c.bf16 %v234_v6, %v232_v5  ;;  %v231_v9 = vld [vmem:[%s804_s17 + $0x20] sm:$0xff]  ;;  %v233_v10 = vld [vmem:[%s804_s17 + $0x30] sm:$0xff]  ;;  %v236_v11 = vld [vmem:[%s804_s17 + $0x48] sm:$0xff] }
  0x13   : > { %673 = vmatprep.subr.bf16.mxu0 %v672_v3  ;;  %v238_v12 = vld [vmem:[%s804_s17 + $0x58] sm:$0xff]  ;;  %v678_v13 = vpack.c.bf16 %v233_v10, %v231_v9  ;;  %v235_v15 = vld [vmem:[%s804_s17 + $0x40] sm:$0xff]  ;;  %v237_v16 = vld [vmem:[%s804_s17 + $0x50] sm:$0xff] }
  0x14   : > { %675 = vmatpush1.bf16.msra.mxu0 %v674_v7  ;;  %v680_v14 = vpack.c.bf16 %v238_v12, %v236_v11  ;;  %v240_v17 = vld [vmem:[%s804_s17 + $0x68] sm:$0xff]  ;;  %v242_v18 = vld [vmem:[%s804_s17 + $0x78] sm:$0xff]  ;;  %v682_v19 = vpack.c.bf16 %v237_v16, %v235_v15  ;;  %v239_v21 = vld [vmem:[%s804_s17 + $0x60] sm:$0xff] }
  0x15   : > { %677 = vmatprep.subr.bf16.mxu0 %v676_v8  ;;  %v684_v20 = vpack.c.bf16 %v242_v18, %v240_v17  ;;  %v241_v22 = vld [vmem:[%s804_s17 + $0x70] sm:$0xff]  ;;  %v244_v23 = vld [vmem:[%s804_s17 + $0x88] sm:$0xff]  ;;  %v246_v24 = vld [vmem:[%s804_s17 + $0x98] sm:$0xff] }
  0x16   : > { %v686_v25 = vpack.c.bf16 %v241_v22, %v239_v21  ;;  %v688_v26 = vpack.c.bf16 %v246_v24, %v244_v23  ;;  %v243_v27 = vld [vmem:[%s804_s17 + $0x80] sm:$0xff]  ;;  %v245_v28 = vld [vmem:[%s804_s17 + $0x90] sm:$0xff]  ;;  %v248_v29 = vld [vmem:[%s804_s17 + $0xa8] sm:$0xff] }
  0x17   : > { %v250_v30 = vld [vmem:[%s804_s17 + $0xb8] sm:$0xff]  ;;  %v690_v31 = vpack.c.bf16 %v245_v28, %v243_v27  ;;  %v247_v33 = vld [vmem:[%s804_s17 + $0xa0] sm:$0xff]  ;;  %v249_v34 = vld [vmem:[%s804_s17 + $0xb0] sm:$0xff] }
  0x18   : > { %679 = vmatpush1.bf16.msra.mxu0 %v678_v13  ;;  %v692_v32 = vpack.c.bf16 %v250_v30, %v248_v29  ;;  %v252_v35 = vld [vmem:[%s804_s17 + $0xc8] sm:$0xff]  ;;  %v254_v36 = vld [vmem:[%s804_s17 + $0xd8] sm:$0xff]  ;;  %v694_v37 = vpack.c.bf16 %v249_v34, %v247_v33  ;;  %v251_v39 = vld [vmem:[%s804_s17 + $0xc0] sm:$0xff] }
  0x19   : > { %681 = vmatprep.subr.bf16.mxu0 %v680_v14  ;;  %v696_v38 = vpack.c.bf16 %v254_v36, %v252_v35  ;;  %v253_v40 = vld [vmem:[%s804_s17 + $0xd0] sm:$0xff]  ;;  %v212_v41 = vld [vmem:[%s838_s21 + $0x8] sm:$0xff]  ;;  %v258_v43 = vld [vmem:[%s804_s17 + $0xf8] sm:$0xff] }
  0x1a   : > { %v256_v42 = vld [vmem:[%s804_s17 + $0xe8] sm:$0xff]  ;;  %355 = vmatprep.mubr.f32.mxu0 %v212_v41  ;;  %v698_v44 = vpack.c.bf16 %v253_v40, %v251_v39  ;;  %v255_v46 = vld [vmem:[%s804_s17 + $0xe0] sm:$0xff]  ;;  %v257_v47 = vld [vmem:[%s804_s17 + $0xf0] sm:$0xff] }
  0x1b   : > { %v700_v45 = vpack.c.bf16 %v258_v43, %v256_v42  ;;  %v260_v48 = vld [vmem:[%s804_s17 + $0x108] sm:$0xff]  ;;  %v262_v49 = vld [vmem:[%s804_s17 + $0x118] sm:$0xff]  ;;  %v702_v50 = vpack.c.bf16 %v257_v47, %v255_v46  ;;  %v259_v52 = vld [vmem:[%s804_s17 + $0x100] sm:$0xff] }
  0x1c   : > { %683 = vmatpush1.bf16.msra.mxu0 %v682_v19  ;;  %v704_v51 = vpack.c.bf16 %v262_v49, %v260_v48  ;;  %v261_v53 = vld [vmem:[%s804_s17 + $0x110] sm:$0xff]  ;;  %v264_v54 = vld [vmem:[%s804_s17 + $0x128] sm:$0xff]  ;;  %v266_v55 = vld [vmem:[%s804_s17 + $0x138] sm:$0xff]  ;;  %v769_v48 = vmov 0.0  }
  0x1d   : > { %685 = vmatprep.subr.bf16.mxu0 %v684_v20  ;;  %v706_v56 = vpack.c.bf16 %v261_v53, %v259_v52  ;;  %v708_v57 = vpack.c.bf16 %v266_v55, %v264_v54  ;;  %v263_v58 = vld [vmem:[%s804_s17 + $0x120] sm:$0xff]  ;;  %v265_v59 = vld [vmem:[%s804_s17 + $0x130] sm:$0xff]  ;;  %v268_v60 = vld [vmem:[%s804_s17 + $0x148] sm:$0xff]  ;;  %501 = vmatprep.mubr.f32.mxu1 %v769_v48 }
  0x1e   : > { %v270_v61 = vld [vmem:[%s804_s17 + $0x158] sm:$0xff]  ;;  %v710_v62 = vpack.c.bf16 %v265_v59, %v263_v58  ;;  %v267_v0 = vld [vmem:[%s804_s17 + $0x140] sm:$0xff]  ;;  %v269_v1 = vld [vmem:[%s804_s17 + $0x150] sm:$0xff] }
  0x1f   : > { %v712_v63 = vpack.c.bf16 %v270_v61, %v268_v60  ;;  %v272_v2 = vld [vmem:[%s804_s17 + $0x168] sm:$0xff]  ;;  %v274_v3 = vld [vmem:[%s804_s17 + $0x178] sm:$0xff]  ;;  %v714_v4 = vpack.c.bf16 %v269_v1, %v267_v0  ;;  %v271_v6 = vld [vmem:[%s804_s17 + $0x160] sm:$0xff] }
  0x20   : > { %687 = vmatpush1.bf16.msra.mxu0 %v686_v25  ;;  %v716_v5 = vpack.c.bf16 %v274_v3, %v272_v2  ;;  %v273_v7 = vld [vmem:[%s804_s17 + $0x170] sm:$0xff]  ;;  %v276_v8 = vld [vmem:[%s804_s17 + $0x188] sm:$0xff]  ;;  %v278_v9 = vld [vmem:[%s804_s17 + $0x198] sm:$0xff] }
  0x21   : > { %689 = vmatprep.subr.bf16.mxu0 %v688_v26  ;;  %v718_v10 = vpack.c.bf16 %v273_v7, %v271_v6  ;;  %v720_v11 = vpack.c.bf16 %v278_v9, %v276_v8  ;;  %v275_v12 = vld [vmem:[%s804_s17 + $0x180] sm:$0xff]  ;;  %v277_v13 = vld [vmem:[%s804_s17 + $0x190] sm:$0xff]  ;;  %v280_v14 = vld [vmem:[%s804_s17 + $0x1a8] sm:$0xff] }
  0x22   : > { %v282_v15 = vld [vmem:[%s804_s17 + $0x1b8] sm:$0xff]  ;;  %v722_v16 = vpack.c.bf16 %v277_v13, %v275_v12  ;;  %v279_v18 = vld [vmem:[%s804_s17 + $0x1a0] sm:$0xff]  ;;  %v281_v19 = vld [vmem:[%s804_s17 + $0x1b0] sm:$0xff] }
  0x23   : > { %v724_v17 = vpack.c.bf16 %v282_v15, %v280_v14  ;;  %v284_v20 = vld [vmem:[%s804_s17 + $0x1c8] sm:$0xff]  ;;  %v286_v21 = vld [vmem:[%s804_s17 + $0x1d8] sm:$0xff]  ;;  %v726_v22 = vpack.c.bf16 %v281_v19, %v279_v18  ;;  %v283_v24 = vld [vmem:[%s804_s17 + $0x1c0] sm:$0xff] }
  0x24   : > { %691 = vmatpush1.bf16.msra.mxu0 %v690_v31  ;;  %v728_v23 = vpack.c.bf16 %v286_v21, %v284_v20  ;;  %v285_v25 = vld [vmem:[%s804_s17 + $0x1d0] sm:$0xff]  ;;  %v288_v26 = vld [vmem:[%s804_s17 + $0x1e8] sm:$0xff]  ;;  %v290_v27 = vld [vmem:[%s804_s17 + $0x1f8] sm:$0xff] }
  0x25   : > { %693 = vmatprep.subr.bf16.mxu0 %v692_v32  ;;  %v730_v28 = vpack.c.bf16 %v285_v25, %v283_v24  ;;  %v732_v29 = vpack.c.bf16 %v290_v27, %v288_v26  ;;  %v287_v30 = vld [vmem:[%s804_s17 + $0x1e0] sm:$0xff]  ;;  %v289_v31 = vld [vmem:[%s804_s17 + $0x1f0] sm:$0xff]  ;;  %v214_v34 = vld [vmem:[%s838_s21 + $0x18] sm:$0xff] }
  0x26   : > { %v734_v32 = vpack.c.bf16 %v289_v31, %v287_v30  ;;  %v211_v33 = vld [vmem:[%s838_s21] sm:$0xff]  ;;  %v213_v35 = vld [vmem:[%s838_s21 + $0x10] sm:$0xff]  ;;  %v216_v36 = vld [vmem:[%s838_s21 + $0x28] sm:$0xff] }
  0x27   : > { %v217_v39 = vld [vmem:[%s838_s21 + $0x30] sm:$0xff]  ;;  %v220_v40 = vld [vmem:[%s838_s21 + $0x48] sm:$0xff]  ;;  %v219_v41 = vld [vmem:[%s838_s21 + $0x40] sm:$0xff] }
  0x28   : > { %695 = vmatpush1.bf16.msra.mxu0 %v694_v37  ;;  %v215_v37 = vld [vmem:[%s838_s21 + $0x20] sm:$0xff]  ;;  %v222_v42 = vld [vmem:[%s838_s21 + $0x58] sm:$0xff]  ;;  %v221_v43 = vld [vmem:[%s838_s21 + $0x50] sm:$0xff] }
  0x29   : > { %697 = vmatprep.subr.bf16.mxu0 %v696_v38  ;;  %v218_v38 = vld [vmem:[%s838_s21 + $0x38] sm:$0xff]  ;;  %v225_v47 = vld [vmem:[%s838_s21 + $0x70] sm:$0xff]  ;;  %v404_v9 = vld [vmem:[%s205_s25] sm:$0xff] }
  0x2a   : > { %v226_v46 = vld [vmem:[%s838_s21 + $0x78] sm:$0xff]  ;;  %v408_v13 = vld [vmem:[%s205_s25 + $0x20] sm:$0xff]  ;;  %v409_v14 = vld [vmem:[%s205_s25 + $0x28] sm:$0xff] }
  0x2b   : > { %v407_v12 = vld [vmem:[%s205_s25 + $0x18] sm:$0xff]  ;;  %v410_v15 = vld [vmem:[%s205_s25 + $0x30] sm:$0xff] }
  0x2c   : > { %699 = vmatpush1.bf16.msra.mxu0 %v698_v44  ;;  %v224_v44 = vld [vmem:[%s838_s21 + $0x68] sm:$0xff] }
  0x2d   : > { %701 = vmatprep.subr.bf16.mxu0 %v700_v45  ;;  %v223_v45 = vld [vmem:[%s838_s21 + $0x60] sm:$0xff] }
  0x30   : > { %703 = vmatpush1.bf16.msra.mxu0 %v702_v50 }
  0x31   : > { %705 = vmatprep.subr.bf16.mxu0 %v704_v51 }
  0x34   : > { %707 = vmatpush1.bf16.msra.mxu0 %v706_v56 }
  0x35   : > { %709 = vmatprep.subr.bf16.mxu0 %v708_v57 }
  0x38   : > { %711 = vmatpush1.bf16.msra.mxu0 %v710_v62 }
  0x39   : > { %713 = vmatprep.subr.bf16.mxu0 %v712_v63 }
  0x3c   : > { %715 = vmatpush1.bf16.msra.mxu0 %v714_v4 }
  0x3d   : > { %717 = vmatprep.subr.bf16.mxu0 %v716_v5 }
  0x40   : > { %719 = vmatpush1.bf16.msra.mxu0 %v718_v10  ;;  %v405_v10 = vld [vmem:[%s205_s25 + $0x8] sm:$0xff] }
  0x41   : > { %721 = vmatprep.subr.bf16.mxu0 %v720_v11  ;;  %v406_v11 = vld [vmem:[%s205_s25 + $0x10] sm:$0xff] }
  0x44   : > { %723 = vmatpush1.bf16.msra.mxu0 %v722_v16  ;;  %v411_v16 = vld [vmem:[%s205_s25 + $0x38] sm:$0xff] }
  0x45   : > { %725 = vmatprep.subr.bf16.mxu0 %v724_v17 }
  0x48   : > { %727 = vmatpush1.bf16.msra.mxu0 %v726_v22 }
  0x49   : > { %729 = vmatprep.subr.bf16.mxu0 %v728_v23 }
  0x4c   : > { %731 = vmatpush1.bf16.msra.mxu0 %v730_v28 }
  0x4d   : > { %733 = vmatprep.subr.bf16.mxu0 %v732_v29 }
  0x50   : > { %735 = vmatpush1.bf16.msra.mxu0 %v734_v32 }
  0x53   : > { %356 = vmatmul.mubr.f32.vlgmr.msra.gmra.mrb[0].mxu0 %v211_v33 }
  0x54   : > { %361 = vmatprep.mubr.f32.mxu0 %v214_v34 }
  0x57   : > { %362 = vmatmul.mubr.f32.gmra.mrb[2].mxu0 %v213_v35 }
  0x58   : > { %367 = vmatprep.mubr.f32.mxu0 %v216_v36 }
  0x5b   : > { %368 = vmatmul.mubr.f32.gmra.mrb[4].mxu0 %v215_v37 }
  0x5c   : > { %373 = vmatprep.mubr.f32.mxu0 %v218_v38 }
  0x5f   : > { %374 = vmatmul.mubr.f32.gmra.mrb[6].mxu0 %v217_v39 }
  0x60   : > { %379 = vmatprep.mubr.f32.mxu0 %v220_v40 }
  0x63   : > { %380 = vmatmul.mubr.f32.gmra.mrb[8].mxu0 %v219_v41 }
  0x64   : > { %385 = vmatprep.mubr.f32.mxu0 %v222_v42 }
  0x67   : > { %386 = vmatmul.mubr.f32.gmra.mrb[10].mxu0 %v221_v43 }
  0x68   : > { %391 = vmatprep.mubr.f32.mxu0 %v224_v44 }
  0x6b   : > { %392 = vmatmul.mubr.f32.gmra.mrb[12].mxu0 %v223_v45 }
  0x6c   : > { %397 = vmatprep.mubr.f32.mxu0 %v226_v46 }
  0x6f   : > { %398 = vmatmul.mubr.f32.gmra.mrb[14].mxu0 %v225_v47 }
 0x126   : > { %v357_v49 = vpop.f32.mrb[0].mxu0 }
 0x127   : > { %v359_v50 = vpop.f32.mrb[1].mxu0 }
 0x12a   : > { %v363_v51 = vpop.f32.mrb[2].mxu0 }
 0x12b   : > { %v738_v52 = vpack.c.bf16 %v363_v51, %v357_v49  ;;  %v365_v53 = vpop.f32.mrb[3].mxu0 }
 0x12c   : > { %v736_v54 = vpack.c.bf16 %v365_v53, %v359_v50 }
 0x12e   : > { %v369_v55 = vpop.f32.mrb[4].mxu0  ;;  %737 = vmatprep.subr.bf16.mxu1 %v736_v54 }
 0x12f   : > { %v371_v56 = vpop.f32.mrb[5].mxu0  ;;  %739 = vmatpush1.bf16.msra.mxu1 %v738_v52 }
 0x132   : > { %v375_v57 = vpop.f32.mrb[6].mxu0 }
 0x133   : > { %v742_v58 = vpack.c.bf16 %v375_v57, %v369_v55  ;;  %v377_v59 = vpop.f32.mrb[7].mxu0 }
 0x134   : > { %v740_v60 = vpack.c.bf16 %v377_v59, %v371_v56 }
 0x136   : > { %v381_v61 = vpop.f32.mrb[8].mxu0  ;;  %741 = vmatprep.subr.bf16.mxu1 %v740_v60 }
 0x137   : > { %v383_v62 = vpop.f32.mrb[9].mxu0  ;;  %743 = vmatpush1.bf16.msra.mxu1 %v742_v58 }
 0x13a   : > { %v387_v63 = vpop.f32.mrb[10].mxu0 }
 0x13b   : > { %v746_v0 = vpack.c.bf16 %v387_v63, %v381_v61  ;;  %v389_v1 = vpop.f32.mrb[11].mxu0 }
 0x13c   : > { %v744_v2 = vpack.c.bf16 %v389_v1, %v383_v62 }
 0x13e   : > { %v393_v3 = vpop.f32.mrb[12].mxu0  ;;  %745 = vmatprep.subr.bf16.mxu1 %v744_v2 }
 0x13f   : > { %v395_v4 = vpop.f32.mrb[13].mxu0  ;;  %747 = vmatpush1.bf16.msra.mxu1 %v746_v0 }
 0x142   : > { %v399_v5 = vpop.f32.mrb[14].mxu0 }
 0x143   : > { %v750_v6 = vpack.c.bf16 %v399_v5, %v393_v3  ;;  %v401_v7 = vpop.f32.mrb[15].mxu0 }
 0x144   : > { %v748_v8 = vpack.c.bf16 %v401_v7, %v395_v4 }
 0x146   : > { %749 = vmatprep.subr.bf16.mxu1 %v748_v8 }
 0x147   : > { %751 = vmatpush1.bf16.msra.mxu1 %v750_v6 }
 0x14a   : > { %658 = vmatmul.mubr.msk.f32.vlgmr.msra.gmra.mrb[0].mxu1 %vm412_vm0, %v404_v9 }
 0x14b   : > { %507 = vmatprep.mubr.f32.mxu1 %v769_v48 }
 0x14e   : > { %659 = vmatmul.mubr.msk.f32.gmra.mrb[2].mxu1 %vm412_vm0, %v405_v10 }
 0x14f   : > { %513 = vmatprep.mubr.f32.mxu1 %v769_v48 }
 0x152   : > { %660 = vmatmul.mubr.msk.f32.gmra.mrb[4].mxu1 %vm412_vm0, %v406_v11 }
 0x153   : > { %519 = vmatprep.mubr.f32.mxu1 %v769_v48 }
 0x156   : > { %661 = vmatmul.mubr.msk.f32.gmra.mrb[6].mxu1 %vm412_vm0, %v407_v12 }
 0x157   : > { %525 = vmatprep.mubr.f32.mxu1 %v769_v48 }
 0x15a   : > { %662 = vmatmul.mubr.msk.f32.gmra.mrb[8].mxu1 %vm412_vm0, %v408_v13 }
 0x15b   : > { %531 = vmatprep.mubr.f32.mxu1 %v769_v48 }
 0x15e   : > { %663 = vmatmul.mubr.msk.f32.gmra.mrb[10].mxu1 %vm412_vm0, %v409_v14 }
 0x15f   : > { %537 = vmatprep.mubr.f32.mxu1 %v769_v48 }
 0x162   : > { %664 = vmatmul.mubr.msk.f32.gmra.mrb[12].mxu1 %vm412_vm0, %v410_v15 }
 0x163   : > { %543 = vmatprep.mubr.f32.mxu1 %v769_v48 }
 0x166   : > { %665 = vmatmul.mubr.msk.f32.gmra.mrb[14].mxu1 %vm412_vm0, %v411_v16 }
 0x21d   : > { %v503_v17 = vpop.f32.mrb[0].mxu1 }
 0x21e   : > { %550 = vst [vmem:[%s911_s28] sm:$0xff] %v503_v17  ;;  %v505_v18 = vpop.f32.mrb[1].mxu1 }
 0x21f   : > { %551 = vst [vmem:[%s911_s28 + $0x8] sm:$0xff] %v505_v18 }
 0x221   : > { %v509_v19 = vpop.f32.mrb[2].mxu1 }
 0x222   : > { %552 = vst [vmem:[%s911_s28 + $0x10] sm:$0xff] %v509_v19  ;;  %v511_v20 = vpop.f32.mrb[3].mxu1 }
 0x223   : > { %553 = vst [vmem:[%s911_s28 + $0x18] sm:$0xff] %v511_v20 }
 0x225   : > { %v515_v21 = vpop.f32.mrb[4].mxu1 }
 0x226   : > { %554 = vst [vmem:[%s911_s28 + $0x20] sm:$0xff] %v515_v21  ;;  %v517_v22 = vpop.f32.mrb[5].mxu1 }
 0x227   : > { %555 = vst [vmem:[%s911_s28 + $0x28] sm:$0xff] %v517_v22 }
 0x229   : > { %v521_v23 = vpop.f32.mrb[6].mxu1 }
 0x22a   : > { %556 = vst [vmem:[%s911_s28 + $0x30] sm:$0xff] %v521_v23  ;;  %v523_v24 = vpop.f32.mrb[7].mxu1 }
 0x22b   : > { %557 = vst [vmem:[%s911_s28 + $0x38] sm:$0xff] %v523_v24 }
 0x22d   : > { %v527_v25 = vpop.f32.mrb[8].mxu1 }
 0x22e   : > { %558 = vst [vmem:[%s911_s28 + $0x40] sm:$0xff] %v527_v25  ;;  %v529_v26 = vpop.f32.mrb[9].mxu1 }
 0x22f   : > { %559 = vst [vmem:[%s911_s28 + $0x48] sm:$0xff] %v529_v26 }
 0x231   : > { %v533_v27 = vpop.f32.mrb[10].mxu1 }
 0x232   : > { %560 = vst [vmem:[%s911_s28 + $0x50] sm:$0xff] %v533_v27  ;;  %v535_v28 = vpop.f32.mrb[11].mxu1 }
 0x233   : > { %561 = vst [vmem:[%s911_s28 + $0x58] sm:$0xff] %v535_v28 }
 0x235   : > { %v539_v29 = vpop.f32.mrb[12].mxu1 }
 0x236   : > { %562 = vst [vmem:[%s911_s28 + $0x60] sm:$0xff] %v539_v29  ;;  %v541_v30 = vpop.f32.mrb[13].mxu1 }
 0x237   : > { %563 = vst [vmem:[%s911_s28 + $0x68] sm:$0xff] %v541_v30 }
 0x239   : > { %v545_v31 = vpop.f32.mrb[14].mxu1 }
 0x23a   : > { %564 = vst [vmem:[%s911_s28 + $0x70] sm:$0xff] %v545_v31  ;;  %v547_v32 = vpop.f32.mrb[15].mxu1 }
 0x23b   : > { %565 = vst [vmem:[%s911_s28 + $0x78] sm:$0xff] %v547_v32 }
 0x23c PF: > { %s13_s12 = sadd.s32 1, %s767_s12  }
 0x23d   : > { %p10_p4 = scmp.ge.s32.totalorder %s13_s12, 4  }
 0x23f   :  { %12 = sbr.rel (!%p10_p4) target bundleno = 1 (0x1), region = 68 }

</bundles_post_ra>
